<compile_context>
chip_gen: v5e
topology: v5e:2x2
jax: 0.10.0
libtpu: 0.0.40
codegen_flags: <defaults>
</compile_context>

<pallas_src>
import jax
import jax.numpy as jnp
import numpy as np
from jax.experimental import pallas as pl
from jax.experimental.pallas import tpu as pltpu

EMBED_DIM = 50
HIDDEN_DIM = 100
NUM_FILTERS = 10
KERNEL_SIZE = 3
OUTPUT_DIM = 10
CONV_LEN = HIDDEN_DIM - KERNEL_SIZE + 1      # 98
POOL_LEN = CONV_LEN // 2                     # 49

HIDDEN_PAD = 128                             # 100 -> 128 (one clean lane width)
POOL_PAD = 64                                # 49  -> 64  (10*64 = 640 = 5*128)
FC_K = NUM_FILTERS * POOL_PAD                # 640
CONV_SLAB = 2 * FC_K                         # even half + odd half = 1280
OUT_PAD = 128                                # 10 -> 128 (lane-dense output stores)


def _cnn_block_kernel(x_ref, w1_ref, b1_ref, a_ref, ba_ref, w2_ref, b2_ref, o_ref):
    # Linear(embed -> hidden), hidden padded to 128 lanes.            (MXU)
    h = jnp.dot(x_ref[...], w1_ref[...], preferred_element_type=jnp.float32) + b1_ref[...]
    # Conv1d folded into one banded matmul: per filter, even conv positions land in the
    # first 640 lanes, odd positions in the last 640 lanes.           (MXU)
    cc = jnp.dot(h, a_ref[...], preferred_element_type=jnp.float32) + ba_ref[...]
    # MaxPool1d(kernel=2, stride=2): aligned pairwise max.            (VPU)
    m = jnp.maximum(cc[:, :FC_K], cc[:, FC_K:])
    # fc: one wide contraction (K=640), output padded to 128 lanes.   (MXU)
    o = jnp.dot(m, w2_ref[...], preferred_element_type=jnp.float32) + b2_ref[...]
    o_ref[...] = o.astype(o_ref.dtype)


def _prep_weights(params):
    """Expand module weights into the kernel's lane-padded layout (zeros in padding)."""
    w1, b1, wc, bc, w2, b2 = params

    # Linear weights, hidden padded 100 -> 128 with zero columns.
    w1p = jnp.zeros((EMBED_DIM, HIDDEN_PAD), jnp.float32).at[:, :HIDDEN_DIM].set(w1)
    b1p = jnp.zeros((1, HIDDEN_PAD), jnp.float32).at[0, :HIDDEN_DIM].set(b1)

    # Banded conv matrix A (HIDDEN_PAD, 1280):
    #   even half: column f*64 + p        holds conv position t = 2p      (p < 49)
    #   odd  half: column 640 + f*64 + p  holds conv position t = 2p + 1
    f, p, k = np.meshgrid(np.arange(NUM_FILTERS), np.arange(POOL_LEN),
                          np.arange(KERNEL_SIZE), indexing="ij")
    vals = wc[f, k]                                            # (10, 49, 3)
    A = jnp.zeros((HIDDEN_PAD, CONV_SLAB), jnp.float32)
    A = A.at[2 * p + k, f * POOL_PAD + p].set(vals)
    A = A.at[2 * p + 1 + k, FC_K + f * POOL_PAD + p].set(vals)

    # Conv bias broadcast to the valid (f, p) columns of both halves; padding stays 0
    # (safe: the matching fc weight rows are exactly zero).
    f2, p2 = np.meshgrid(np.arange(NUM_FILTERS), np.arange(POOL_LEN), indexing="ij")
    bA = jnp.zeros((1, CONV_SLAB), jnp.float32)
    bA = bA.at[0, f2 * POOL_PAD + p2].set(bc[f2])
    bA = bA.at[0, FC_K + f2 * POOL_PAD + p2].set(bc[f2])

    # fc weight: PyTorch flattens (B, C, L) -> (B, C*L) filter-major; pad pool 49 -> 64
    # and output 10 -> 128 with zeros.
    w2r = w2.reshape(NUM_FILTERS, POOL_LEN, OUTPUT_DIM)
    w2r = jnp.pad(w2r, ((0, 0), (0, POOL_PAD - POOL_LEN), (0, 0)))
    w2p = jnp.zeros((FC_K, OUT_PAD), jnp.float32).at[:, :OUTPUT_DIM].set(
        w2r.reshape(FC_K, OUTPUT_DIM))
    b2p = jnp.zeros((1, OUT_PAD), jnp.float32).at[0, :OUTPUT_DIM].set(b2)
    return w1p, b1p, A, bA, w2p, b2p


def cnn_block_forward(x, params, *, tb=512):
    """Forward pass equivalent to cnnBlock.forward."""
    x2 = x.reshape(-1, EMBED_DIM).astype(jnp.float32)          # == x.view(-1, 50)
    batch = x2.shape[0]

    # Large batch tile (multiple of 8; 512 = multiple of 128/256 for the MXU rows),
    # shrunk for small batches so we don't pad 16 rows up to 512.
    tb_eff = min(tb, max(8, -(-batch // 8) * 8))
    pad = (-batch) % tb_eff
    if pad:
        x2 = jnp.pad(x2, ((0, pad), (0, 0)))
    bpad = x2.shape[0]

    w1p, b1p, A, bA, w2p, b2p = _prep_weights(params)

    out = pl.pallas_call(
        _cnn_block_kernel,
        out_shape=jax.ShapeDtypeStruct((bpad, OUT_PAD), jnp.float32),
        grid_spec=pltpu.PrefetchScalarGridSpec(
            num_scalar_prefetch=0,
            grid=(bpad // tb_eff,),
            in_specs=[
                pl.BlockSpec((tb_eff, EMBED_DIM), lambda i: (i, 0)),       # x tile
                pl.BlockSpec((EMBED_DIM, HIDDEN_PAD), lambda i: (0, 0)),   # W1 (padded)
                pl.BlockSpec((1, HIDDEN_PAD), lambda i: (0, 0)),           # b1 (padded)
                pl.BlockSpec((HIDDEN_PAD, CONV_SLAB), lambda i: (0, 0)),   # banded conv A
                pl.BlockSpec((1, CONV_SLAB), lambda i: (0, 0)),            # conv bias slab
                pl.BlockSpec((FC_K, OUT_PAD), lambda i: (0, 0)),           # fc W (padded)
                pl.BlockSpec((1, OUT_PAD), lambda i: (0, 0)),              # fc b (padded)
            ],
            out_specs=pl.BlockSpec((tb_eff, OUT_PAD), lambda i: (i, 0)),
        ),
        compiler_params=pltpu.CompilerParams(dimension_semantics=("parallel",)),
    )(x2, w1p, b1p, A, bA, w2p, b2p)
    return out[:batch, :OUTPUT_DIM]


def ref_forward(x, params):
    """Pure-JAX reference with identical semantics to the PyTorch module."""
    w1, b1, wc, bc, w2, b2 = params
    x2 = x.reshape(-1, EMBED_DIM)
    h = x2 @ w1 + b1                                                   # (B, 100)
    conv = bc[None, :, None] + sum(
        wc[None, :, k, None] * h[:, None, k:k + CONV_LEN] for k in range(KERNEL_SIZE)
    )                                                                  # (B, 10, 98)
    pooled = jnp.max(
        conv[:, :, : 2 * POOL_LEN].reshape(-1, NUM_FILTERS, POOL_LEN, 2), axis=-1
    )                                                                  # (B, 10, 49)
    flat = pooled.reshape(-1, NUM_FILTERS * POOL_LEN)                  # filter-major flatten
    return flat @ w2 + b2


def init_params(key):
    """Deterministic synthetic parameters (PyTorch-style uniform fan-in init)."""
    ks = jax.random.split(key, 6)
    s1 = 1.0 / np.sqrt(EMBED_DIM)
    w1 = jax.random.uniform(ks[0], (EMBED_DIM, HIDDEN_DIM), jnp.float32, -s1, s1)
    b1 = jax.random.uniform(ks[1], (HIDDEN_DIM,), jnp.float32, -s1, s1)
    s2 = 1.0 / np.sqrt(KERNEL_SIZE)
    wc = jax.random.uniform(ks[2], (NUM_FILTERS, KERNEL_SIZE), jnp.float32, -s2, s2)
    bc = jax.random.uniform(ks[3], (NUM_FILTERS,), jnp.float32, -s2, s2)
    s3 = 1.0 / np.sqrt(NUM_FILTERS * POOL_LEN)
    w2 = jax.random.uniform(ks[4], (NUM_FILTERS * POOL_LEN, OUTPUT_DIM), jnp.float32, -s3, s3)
    b2 = jax.random.uniform(ks[5], (OUTPUT_DIM,), jnp.float32, -s3, s3)
    return (w1, b1, wc, bc, w2, b2)


if __name__ == "__main__":
    key = jax.random.PRNGKey(0)
    pkey, xkey = jax.random.split(key)
    params = init_params(pkey)

    x = jax.random.normal(xkey, (16, EMBED_DIM), jnp.float32)   # batch=16, embed_dim=50

    out = cnn_block_forward(x, params)
    out = jax.block_until_ready(out)

    ref = ref_forward(x, params)
    assert out.shape == (16, OUTPUT_DIM)
    np.testing.assert_allclose(np.asarray(out), np.asarray(ref), rtol=1e-4, atol=1e-4)
    print("KERNEL_OK")
</pallas_src>

<mosaic_0001>
module attributes {stable_mosaic.version = 11 : i64} {
  func.func @_cnn_block_kernel(%arg0: i32, %arg1: memref<16x50xf32, #tpu.memory_space<vmem>>, %arg2: memref<50x128xf32, #tpu.memory_space<vmem>>, %arg3: memref<1x128xf32, #tpu.memory_space<vmem>>, %arg4: memref<128x1280xf32, #tpu.memory_space<vmem>>, %arg5: memref<1x1280xf32, #tpu.memory_space<vmem>>, %arg6: memref<640x128xf32, #tpu.memory_space<vmem>>, %arg7: memref<1x128xf32, #tpu.memory_space<vmem>>, %arg8: memref<16x128xf32, #tpu.memory_space<vmem>>) attributes {dimension_semantics = [#tpu.dimension_semantics<parallel>], iteration_bounds = array<i64: 1>, scalar_prefetch = 0 : i64, scratch_operands = 0 : i64, tpu.core_type = #tpu.core_type<tc>, window_params = [{transform_indices = @transform_0, window_bounds = array<i64: 16, 50>}, {pipeline_mode = #tpu.pipeline_mode<synchronous>, transform_indices = @transform_1, window_bounds = array<i64: 50, 128>}, {pipeline_mode = #tpu.pipeline_mode<synchronous>, transform_indices = @transform_2, window_bounds = array<i64: 1, 128>}, {pipeline_mode = #tpu.pipeline_mode<synchronous>, transform_indices = @transform_3, window_bounds = array<i64: 128, 1280>}, {pipeline_mode = #tpu.pipeline_mode<synchronous>, transform_indices = @transform_4, window_bounds = array<i64: 1, 1280>}, {pipeline_mode = #tpu.pipeline_mode<synchronous>, transform_indices = @transform_5, window_bounds = array<i64: 640, 128>}, {pipeline_mode = #tpu.pipeline_mode<synchronous>, transform_indices = @transform_6, window_bounds = array<i64: 1, 128>}, {transform_indices = @transform_7, window_bounds = array<i64: 16, 128>}]} {
    %c0 = arith.constant 0 : index
    %c0_0 = arith.constant 0 : index
    %0 = vector.load %arg1[%c0, %c0_0] : memref<16x50xf32, #tpu.memory_space<vmem>>, vector<16x50xf32>
    %c0_1 = arith.constant 0 : index
    %c0_2 = arith.constant 0 : index
    %1 = vector.load %arg2[%c0_1, %c0_2] : memref<50x128xf32, #tpu.memory_space<vmem>>, vector<50x128xf32>
    %cst = arith.constant dense<0.000000e+00> : vector<16x128xf32>
    %2 = tpu.matmul %0, %1, %cst {dimension_numbers = #tpu.dot_dimension_numbers<[1], [0], [0], [1], [0, 0, 1, 1], [], []>} : vector<16x50xf32>, vector<50x128xf32>, vector<16x128xf32> -> vector<16x128xf32>
    %c0_3 = arith.constant 0 : index
    %c0_4 = arith.constant 0 : index
    %3 = vector.load %arg3[%c0_3, %c0_4] : memref<1x128xf32, #tpu.memory_space<vmem>>, vector<1x128xf32>
    %4 = vector.broadcast %3 : vector<1x128xf32> to vector<16x128xf32>
    %5 = arith.addf %2, %4 : vector<16x128xf32>
    %c0_5 = arith.constant 0 : index
    %c0_6 = arith.constant 0 : index
    %6 = vector.load %arg4[%c0_5, %c0_6] : memref<128x1280xf32, #tpu.memory_space<vmem>>, vector<128x1280xf32>
    %cst_7 = arith.constant dense<0.000000e+00> : vector<16x1280xf32>
    %7 = tpu.matmul %5, %6, %cst_7 {dimension_numbers = #tpu.dot_dimension_numbers<[1], [0], [0], [1], [0, 0, 1, 1], [], []>} : vector<16x128xf32>, vector<128x1280xf32>, vector<16x1280xf32> -> vector<16x1280xf32>
    %c0_8 = arith.constant 0 : index
    %c0_9 = arith.constant 0 : index
    %8 = vector.load %arg5[%c0_8, %c0_9] : memref<1x1280xf32, #tpu.memory_space<vmem>>, vector<1x1280xf32>
    %9 = vector.broadcast %8 : vector<1x1280xf32> to vector<16x1280xf32>
    %10 = arith.addf %7, %9 : vector<16x1280xf32>
    %11 = vector.extract_strided_slice %10 {offsets = [0, 0], sizes = [16, 640], strides = [1, 1]} : vector<16x1280xf32> to vector<16x640xf32>
    %12 = vector.extract_strided_slice %10 {offsets = [0, 640], sizes = [16, 640], strides = [1, 1]} : vector<16x1280xf32> to vector<16x640xf32>
    %13 = arith.maximumf %11, %12 : vector<16x640xf32>
    %c0_10 = arith.constant 0 : index
    %c0_11 = arith.constant 0 : index
    %14 = vector.load %arg6[%c0_10, %c0_11] : memref<640x128xf32, #tpu.memory_space<vmem>>, vector<640x128xf32>
    %cst_12 = arith.constant dense<0.000000e+00> : vector<16x128xf32>
    %15 = tpu.matmul %13, %14, %cst_12 {dimension_numbers = #tpu.dot_dimension_numbers<[1], [0], [0], [1], [0, 0, 1, 1], [], []>} : vector<16x640xf32>, vector<640x128xf32>, vector<16x128xf32> -> vector<16x128xf32>
    %c0_13 = arith.constant 0 : index
    %c0_14 = arith.constant 0 : index
    %16 = vector.load %arg7[%c0_13, %c0_14] : memref<1x128xf32, #tpu.memory_space<vmem>>, vector<1x128xf32>
    %17 = vector.broadcast %16 : vector<1x128xf32> to vector<16x128xf32>
    %18 = arith.addf %15, %17 : vector<16x128xf32>
    %c0_15 = arith.constant 0 : index
    %c0_16 = arith.constant 0 : index
    %19 = vector.load %arg8[%c0_15, %c0_16] : memref<16x128xf32, #tpu.memory_space<vmem>>, vector<16x128xf32>
    tpu.vector_store %arg8[%c0_15, %c0_16], %18 {strides = array<i32>} : memref<16x128xf32, #tpu.memory_space<vmem>>, vector<16x128xf32>,
    return
  }
  func.func @transform_0(%arg0: i32) -> (i32, i32) {
    %c0_i32 = arith.constant 0 : i32
    %c0_i32_0 = arith.constant 0 : i32
    return %arg0, %c0_i32 : i32, i32
  }
  func.func @transform_1(%arg0: i32) -> (i32, i32) {
    %c0_i32 = arith.constant 0 : i32
    %c0_i32_0 = arith.constant 0 : i32
    %c0_i32_1 = arith.constant 0 : i32
    return %c0_i32, %c0_i32_0 : i32, i32
  }
  func.func @transform_2(%arg0: i32) -> (i32, i32) {
    %c0_i32 = arith.constant 0 : i32
    %c0_i32_0 = arith.constant 0 : i32
    %c0_i32_1 = arith.constant 0 : i32
    return %c0_i32, %c0_i32_0 : i32, i32
  }
  func.func @transform_3(%arg0: i32) -> (i32, i32) {
    %c0_i32 = arith.constant 0 : i32
    %c0_i32_0 = arith.constant 0 : i32
    %c0_i32_1 = arith.constant 0 : i32
    return %c0_i32, %c0_i32_0 : i32, i32
  }
  func.func @transform_4(%arg0: i32) -> (i32, i32) {
    %c0_i32 = arith.constant 0 : i32
    %c0_i32_0 = arith.constant 0 : i32
    %c0_i32_1 = arith.constant 0 : i32
    return %c0_i32, %c0_i32_0 : i32, i32
  }
  func.func @transform_5(%arg0: i32) -> (i32, i32) {
    %c0_i32 = arith.constant 0 : i32
    %c0_i32_0 = arith.constant 0 : i32
    %c0_i32_1 = arith.constant 0 : i32
    return %c0_i32, %c0_i32_0 : i32, i32
  }
  func.func @transform_6(%arg0: i32) -> (i32, i32) {
    %c0_i32 = arith.constant 0 : i32
    %c0_i32_0 = arith.constant 0 : i32
    %c0_i32_1 = arith.constant 0 : i32
    return %c0_i32, %c0_i32_0 : i32, i32
  }
  func.func @transform_7(%arg0: i32) -> (i32, i32) {
    %c0_i32 = arith.constant 0 : i32
    %c0_i32_0 = arith.constant 0 : i32
    return %arg0, %c0_i32 : i32, i32
  }
}

</mosaic_0001>

<bundles_post_ra>
// kernel: tpu_custom_call.1
= control target key start
LH: loop header
LB: loop body
LE: loop exit
PB: predicated region body
PF: predicated region fallthrough
CT: control target
= control target key end

     0   :  { %12 = vsyncpa [#allocation3], 0  ;;  %s1088_s0 = inlined_call_operand.hbm [shape: f32[16,50], index: 0, kind: input, shape index: {}]   ;;  %s1089_s1 = inlined_call_operand.hbm [shape: f32[50,128], index: 1, kind: input, shape index: {}]   ;;  %s1090_s2 = inlined_call_operand.vmem [shape: f32[1,128], index: 2, kind: input, shape index: {}]   ;;  %s1091_s3 = inlined_call_operand.hbm [shape: f32[128,1280], index: 3, kind: input, shape index: {}]   ;;  %s1092_s4 = inlined_call_operand.hbm [shape: f32[1,1280], index: 4, kind: input, shape index: {}]   ;;  %s1093_s5 = inlined_call_operand.hbm [shape: f32[640,128], index: 5, kind: input, shape index: {}]   ;;  %s1094_s6 = inlined_call_operand.vmem [shape: f32[1,128], index: 6, kind: input, shape index: {}]   ;;  %s1095_s7 = inlined_call_operand.hbm [shape: f32[16,128], index: 7, kind: output, shape index: {}]  }
   0x1   :  { %13 = vsyncpa [#allocation6], 0 }
   0x2   :  { %14 = vsyncpa [#allocation9], 0 }
   0x3   :  { %15 = vsyncpa [#allocation4], 0  ;;  %s33_s26 = sshll.u32 %s1089_s1, 4  ;;  %s963_s27 = smov [#allocation5]   ;;  %s34_s26 = int_to_ptr.hbm [resolvable:$true] %s33_s26 }
   0x4   :  { %s35_s28 = sshll.u32 %s963_s27, 4  ;;  %s62_s8 = sshll.u32 %s1092_s4, 4  ;;  %s36_s28 = int_to_ptr.vmem [resolvable:$true] %s35_s28  ;;  %s63_s8 = int_to_ptr.hbm [resolvable:$true] %s62_s8 }
   0x5   :  { %s964_s9 = smov 128   ;;  %s965_s10 = smov 8  }
   0x6   :  { %41 = dma.hbm_to_vmem [thread:$0]  %s34_s26, 896, %s36_s28, [#allocation6], %s964_s9, %s964_s9, %s965_s10  }
   0x7   :  { %s966_s11 = smov [#allocation8]   ;;  %s20_s1 = sshll.u32 %s1088_s0, 4  ;;  %s21_s1 = int_to_ptr.hbm [resolvable:$true] %s20_s1 }
   0x8   :  { %s64_s12 = sshll.u32 %s966_s11, 4  ;;  %s48_s4 = sshll.u32 %s1091_s3, 4  ;;  %s65_s12 = int_to_ptr.vmem [resolvable:$true] %s64_s12  ;;  %s49_s4 = int_to_ptr.hbm [resolvable:$true] %s48_s4 }
   0x9   :  { %67 = dma.hbm_to_vmem [thread:$0]  %s63_s8, 160, %s65_s12, [#allocation9]  }
   0xa   :  { %s967_s17 = smov [#allocation2]   ;;  %s968_s19 = smov [#allocation7]  }
   0xb   :  { %s22_s18 = sshll.u32 %s967_s17, 4  ;;  %s50_s20 = sshll.u32 %s968_s19, 4  ;;  %s23_s18 = int_to_ptr.vmem [resolvable:$true] %s22_s18  ;;  %s51_s20 = int_to_ptr.vmem [resolvable:$true] %s50_s20 }
   0xc   :  { %28 = dma.hbm_to_vmem [thread:$0]  %s21_s1, 256, %s23_s18, [#allocation3], %s964_s9, %s964_s9, %s965_s10  }
   0xd   :  { %s969_s21 = smov 1280   ;;  %s970_s0 = smov 80  }
   0xe   :  { %56 = dma.hbm_to_vmem [thread:$0]  %s49_s4, 20480, %s51_s20, [#allocation6], %s969_s21, %s969_s21, %s970_s0  }
   0xf   :  { %s72_s24 = sshll.u32 %s1093_s5, 4  ;;  %s971_s3 = smov [#allocation10]   ;;  %s73_s24 = int_to_ptr.hbm [resolvable:$true] %s72_s24 }
  0x10   :  { %s74_s25 = sshll.u32 %s971_s3, 4  ;;  %s75_s25 = int_to_ptr.vmem [resolvable:$true] %s74_s25 }
  0x11   :  { %80 = dma.hbm_to_vmem [thread:$0]  %s73_s24, 10240, %s75_s25, [#allocation9], %s964_s9, %s964_s9, %s965_s10  }
  0x12   :  { %955 = dma.done.wait [#allocation3], 256  }
  0x13   :  { %956 = vsyncadd [#allocation3], 4294967040 }
  0x14   :  { %957 = dma.done.wait [#allocation6], 21376  }
  0x15   :  { %958 = vsyncadd [#allocation6], 4294945920 }
  0x16   :  { %959 = dma.done.wait [#allocation9], 10400  }
  0x17   :  { %960 = vsyncadd [#allocation9], 4294956896  ;;  %vm123_vm0 = vcmask 1041408   ;;  %v111_v0 = vld [vmem:[#allocation5 + $0x30] sm:$0x3]  ;;  %v110_v1 = vld [vmem:[#allocation5 + $0x28] sm:$0xff] }
  0x18   :  { %796 = vmatpush.msk.msra.mxu0 %vm123_vm0, %v111_v0  ;;  %v109_v2 = vld [vmem:[#allocation5 + $0x20] sm:$0xff]  ;;  %v300_v3 = vld [vmem:[#allocation7 + $0x4b0] sm:$0xff]  ;;  %v301_v4 = vld [vmem:[#allocation7 + $0x4b8] sm:$0xff]  ;;  %vm116_vm1 = vcmask 408576   ;;  %s972_s28 = smov [#allocation11]   ;;  %s781_s8 = sshll.u32 %s1095_s7, 4  ;;  %s782_s8 = int_to_ptr.hbm [resolvable:$true] %s781_s8 }
  0x19   :  { %v290_v5 = vld [vmem:[#allocation7 + $0x460] sm:$0xff]  ;;  %334 = vmatpush.msra.mxu1 %v300_v3  ;;  %357 = vmatpush.msra.mxu2 %v301_v4  ;;  %v291_v7 = vld [vmem:[#allocation7 + $0x468] sm:$0xff]  ;;  %v280_v8 = vld [vmem:[#allocation7 + $0x410] sm:$0xff]  ;;  %s779_s29 = sshll.u32 %s972_s28, 4  ;;  %s780_s29 = int_to_ptr.vmem [resolvable:$true] %s779_s29 }
  0x1a   :  { %137 = vmatpush.msra.mxu0 %v110_v1  ;;  %v108_v6 = vld [vmem:[#allocation5 + $0x18] sm:$0xff]  ;;  %v281_v9 = vld [vmem:[#allocation7 + $0x418] sm:$0xff]  ;;  %v271_v12 = vld [vmem:[#allocation7 + $0x3c8] sm:$0xff] }
  0x1b   :  { %v107_v10 = vld [vmem:[#allocation5 + $0x10] sm:$0xff]  ;;  %335 = vmatpush.msra.mxu1 %v290_v5  ;;  %358 = vmatpush.msra.mxu2 %v291_v7  ;;  %v270_v11 = vld [vmem:[#allocation7 + $0x3c0] sm:$0xff]  ;;  %v106_v13 = vld [vmem:[#allocation5 + $0x8] sm:$0xff] }
  0x1c   :  { %138 = vmatpush.msra.mxu0 %v109_v2  ;;  %v302_v14 = vld [vmem:[#allocation7 + $0x4c0] sm:$0xff]  ;;  %v260_v15 = vld [vmem:[#allocation7 + $0x370] sm:$0xff]  ;;  %v261_v16 = vld [vmem:[#allocation7 + $0x378] sm:$0xff] }
  0x1d   :  { %336 = vmatpush.msra.mxu1 %v280_v8  ;;  %359 = vmatpush.msra.mxu2 %v281_v9  ;;  %v292_v17 = vld [vmem:[#allocation7 + $0x470] sm:$0xff]  ;;  %v105_v18 = vld [vmem:[#allocation5] sm:$0xff]  ;;  %v103_v19 = vld [vmem:[#allocation2] sm:$0xff] }
  0x1e   :  { %139 = vmatpush.msra.mxu0 %v108_v6  ;;  %380 = vmatpush.msra.mxu3 %v302_v14  ;;  %v250_v20 = vld [vmem:[#allocation7 + $0x320] sm:$0xff]  ;;  %v251_v22 = vld [vmem:[#allocation7 + $0x328] sm:$0xff]  ;;  %v240_v24 = vld [vmem:[#allocation7 + $0x2d0] sm:$0xff] }
  0x1f   :  { %337 = vmatpush.msra.mxu1 %v270_v11  ;;  %360 = vmatpush.msra.mxu2 %v271_v12  ;;  %v282_v21 = vld [vmem:[#allocation7 + $0x420] sm:$0xff]  ;;  %v303_v23 = vld [vmem:[#allocation7 + $0x4c8] sm:$0xff]  ;;  %v272_v25 = vld [vmem:[#allocation7 + $0x3d0] sm:$0xff] }
  0x20   :  { %140 = vmatpush.msra.mxu0 %v107_v10  ;;  %381 = vmatpush.msra.mxu3 %v292_v17  ;;  %v241_v26 = vld [vmem:[#allocation7 + $0x2d8] sm:$0xff]  ;;  %v230_v28 = vld [vmem:[#allocation7 + $0x280] sm:$0xff]  ;;  %v231_v30 = vld [vmem:[#allocation7 + $0x288] sm:$0xff] }
  0x21   :  { %338 = vmatpush.msra.mxu1 %v260_v15  ;;  %361 = vmatpush.msra.mxu2 %v261_v16  ;;  %v293_v27 = vld [vmem:[#allocation7 + $0x478] sm:$0xff]  ;;  %v262_v29 = vld [vmem:[#allocation7 + $0x380] sm:$0xff]  ;;  %v283_v31 = vld [vmem:[#allocation7 + $0x428] sm:$0xff] }
  0x22   :  { %141 = vmatpush.msra.mxu0 %v106_v13  ;;  %382 = vmatpush.msra.mxu3 %v282_v21  ;;  %v220_v32 = vld [vmem:[#allocation7 + $0x230] sm:$0xff]  ;;  %v221_v34 = vld [vmem:[#allocation7 + $0x238] sm:$0xff]  ;;  %v104_v36 = vld [vmem:[#allocation2 + $0x8] sm:$0xff] }
  0x23   :  { %339 = vmatpush.msra.mxu1 %v250_v20  ;;  %362 = vmatpush.msra.mxu2 %v251_v22  ;;  %v252_v33 = vld [vmem:[#allocation7 + $0x330] sm:$0xff]  ;;  %v273_v35 = vld [vmem:[#allocation7 + $0x3d8] sm:$0xff]  ;;  %v210_v37 = vld [vmem:[#allocation7 + $0x1e0] sm:$0xff] }
  0x24   :  { %142 = vmatpush.msra.mxu0 %v105_v18  ;;  %383 = vmatpush.msra.mxu3 %v272_v25  ;;  %v211_v38 = vld [vmem:[#allocation7 + $0x1e8] sm:$0xff]  ;;  %v200_v40 = vld [vmem:[#allocation7 + $0x190] sm:$0xff]  ;;  %v242_v41 = vld [vmem:[#allocation7 + $0x2e0] sm:$0xff] }
  0x25   :  { %797 = vmatmul.msk.f32.vlgmr.msra.gmra.mxu0 %vm116_vm1, %v103_v19  ;;  %340 = vmatpush.msra.mxu1 %v240_v24  ;;  %v263_v39 = vld [vmem:[#allocation7 + $0x388] sm:$0xff]  ;;  %v201_v42 = vld [vmem:[#allocation7 + $0x198] sm:$0xff]  ;;  %v190_v44 = vld [vmem:[#allocation7 + $0x140] sm:$0xff] }
  0x26   :  { %403 = vmatpush.msrb.mxu0 %v303_v23  ;;  %363 = vmatpush.msra.mxu2 %v241_v26  ;;  %v253_v43 = vld [vmem:[#allocation7 + $0x338] sm:$0xff]  ;;  %v232_v45 = vld [vmem:[#allocation7 + $0x290] sm:$0xff]  ;;  %v191_v46 = vld [vmem:[#allocation7 + $0x148] sm:$0xff] }
  0x27   :  { %341 = vmatpush.msra.mxu1 %v230_v28  ;;  %384 = vmatpush.msra.mxu3 %v262_v29  ;;  %v243_v47 = vld [vmem:[#allocation7 + $0x2e8] sm:$0xff]  ;;  %v180_v48 = vld [vmem:[#allocation7 + $0xf0] sm:$0xff]  ;;  %v222_v49 = vld [vmem:[#allocation7 + $0x240] sm:$0xff] }
  0x28   :  { %404 = vmatpush.msrb.mxu0 %v293_v27  ;;  %364 = vmatpush.msra.mxu2 %v231_v30  ;;  %v181_v50 = vld [vmem:[#allocation7 + $0xf8] sm:$0xff]  ;;  %v170_v52 = vld [vmem:[#allocation7 + $0xa0] sm:$0xff]  ;;  %v212_v53 = vld [vmem:[#allocation7 + $0x1f0] sm:$0xff] }
  0x29   :  { %342 = vmatpush.msra.mxu1 %v220_v32  ;;  %385 = vmatpush.msra.mxu3 %v252_v33  ;;  %v233_v51 = vld [vmem:[#allocation7 + $0x298] sm:$0xff]  ;;  %v171_v54 = vld [vmem:[#allocation7 + $0xa8] sm:$0xff]  ;;  %v160_v56 = vld [vmem:[#allocation7 + $0x50] sm:$0xff] }
  0x2a   :  { %405 = vmatpush.msrb.mxu0 %v283_v31  ;;  %365 = vmatpush.msra.mxu2 %v221_v34  ;;  %v223_v55 = vld [vmem:[#allocation7 + $0x248] sm:$0xff]  ;;  %v202_v57 = vld [vmem:[#allocation7 + $0x1a0] sm:$0xff]  ;;  %v161_v58 = vld [vmem:[#allocation7 + $0x58] sm:$0xff] }
  0x2b   :  { %343 = vmatpush.msra.mxu1 %v210_v37  ;;  %386 = vmatpush.msra.mxu3 %v242_v41  ;;  %v213_v59 = vld [vmem:[#allocation7 + $0x1f8] sm:$0xff]  ;;  %v150_v60 = vld [vmem:[#allocation7] sm:$0xff]  ;;  %v192_v61 = vld [vmem:[#allocation7 + $0x150] sm:$0xff] }
  0x2c   :  { %406 = vmatpush.msrb.mxu0 %v273_v35  ;;  %366 = vmatpush.msra.mxu2 %v211_v38  ;;  %v151_v62 = vld [vmem:[#allocation7 + $0x8] sm:$0xff]  ;;  %v304_v63 = vld [vmem:[#allocation7 + $0x4d0] sm:$0xff]  ;;  %v305_v0 = vld [vmem:[#allocation7 + $0x4d8] sm:$0xff] }
  0x2d   :  { %798 = vmatmul.msk.f32.gmra.mxu0 %vm116_vm1, %v104_v36  ;;  %344 = vmatpush.msra.mxu1 %v200_v40  ;;  %v203_v1 = vld [vmem:[#allocation7 + $0x1a8] sm:$0xff]  ;;  %v294_v2 = vld [vmem:[#allocation7 + $0x480] sm:$0xff]  ;;  %v193_v5 = vld [vmem:[#allocation7 + $0x158] sm:$0xff] }
  0x2e   :  { %407 = vmatpush.msrb.mxu0 %v263_v39  ;;  %367 = vmatpush.msra.mxu2 %v201_v42  ;;  %v182_v3 = vld [vmem:[#allocation7 + $0x100] sm:$0xff]  ;;  %v295_v4 = vld [vmem:[#allocation7 + $0x488] sm:$0xff]  ;;  %v284_v6 = vld [vmem:[#allocation7 + $0x430] sm:$0xff] }
  0x2f   :  { %345 = vmatpush.msra.mxu1 %v190_v44  ;;  %387 = vmatpush.msra.mxu3 %v232_v45  ;;  %v172_v7 = vld [vmem:[#allocation7 + $0xb0] sm:$0xff]  ;;  %v285_v8 = vld [vmem:[#allocation7 + $0x438] sm:$0xff]  ;;  %v183_v9 = vld [vmem:[#allocation7 + $0x108] sm:$0xff] }
  0x30   :  { %408 = vmatpush.msrb.mxu0 %v253_v43  ;;  %368 = vmatpush.msra.mxu2 %v191_v46  ;;  %v274_v10 = vld [vmem:[#allocation7 + $0x3e0] sm:$0xff]  ;;  %v275_v12 = vld [vmem:[#allocation7 + $0x3e8] sm:$0xff]  ;;  %v173_v13 = vld [vmem:[#allocation7 + $0xb8] sm:$0xff] }
  0x31   :  { %346 = vmatpush.msra.mxu1 %v180_v48  ;;  %388 = vmatpush.msra.mxu3 %v222_v49  ;;  %v162_v11 = vld [vmem:[#allocation7 + $0x60] sm:$0xff]  ;;  %v264_v14 = vld [vmem:[#allocation7 + $0x390] sm:$0xff]  ;;  %v265_v16 = vld [vmem:[#allocation7 + $0x398] sm:$0xff] }
  0x32   :  { %409 = vmatpush.msrb.mxu0 %v243_v47  ;;  %369 = vmatpush.msra.mxu2 %v181_v50  ;;  %v152_v15 = vld [vmem:[#allocation7 + $0x10] sm:$0xff]  ;;  %v163_v17 = vld [vmem:[#allocation7 + $0x68] sm:$0xff]  ;;  %v254_v18 = vld [vmem:[#allocation7 + $0x340] sm:$0xff] }
  0x33   :  { %347 = vmatpush.msra.mxu1 %v170_v52  ;;  %389 = vmatpush.msra.mxu3 %v212_v53  ;;  %v306_v19 = vld [vmem:[#allocation7 + $0x4e0] sm:$0xff]  ;;  %v255_v20 = vld [vmem:[#allocation7 + $0x348] sm:$0xff]  ;;  %v153_v21 = vld [vmem:[#allocation7 + $0x18] sm:$0xff] }
  0x34   :  { %410 = vmatpush.msrb.mxu0 %v233_v51  ;;  %370 = vmatpush.msra.mxu2 %v171_v54  ;;  %v244_v22 = vld [vmem:[#allocation7 + $0x2f0] sm:$0xff]  ;;  %v307_v23 = vld [vmem:[#allocation7 + $0x4e8] sm:$0xff]  ;;  %v245_v24 = vld [vmem:[#allocation7 + $0x2f8] sm:$0xff] }
  0x35   :  { %348 = vmatpush.msra.mxu1 %v160_v56  ;;  %390 = vmatpush.msra.mxu3 %v202_v57  ;;  %v296_v25 = vld [vmem:[#allocation7 + $0x490] sm:$0xff]  ;;  %v234_v26 = vld [vmem:[#allocation7 + $0x2a0] sm:$0xff]  ;;  %v297_v27 = vld [vmem:[#allocation7 + $0x498] sm:$0xff] }
  0x36   :  { %411 = vmatpush.msrb.mxu0 %v223_v55  ;;  %371 = vmatpush.msra.mxu2 %v161_v58  ;;  %v235_v28 = vld [vmem:[#allocation7 + $0x2a8] sm:$0xff]  ;;  %v286_v29 = vld [vmem:[#allocation7 + $0x440] sm:$0xff]  ;;  %v224_v30 = vld [vmem:[#allocation7 + $0x250] sm:$0xff] }
  0x37   :  { %349 = vmatpush.msra.mxu1 %v150_v60  ;;  %391 = vmatpush.msra.mxu3 %v192_v61  ;;  %v287_v31 = vld [vmem:[#allocation7 + $0x448] sm:$0xff]  ;;  %v225_v32 = vld [vmem:[#allocation7 + $0x258] sm:$0xff]  ;;  %v276_v33 = vld [vmem:[#allocation7 + $0x3f0] sm:$0xff] }
  0x38   :  { %412 = vmatpush.msrb.mxu0 %v213_v59  ;;  %372 = vmatpush.msra.mxu2 %v151_v62  ;;  %v214_v34 = vld [vmem:[#allocation7 + $0x200] sm:$0xff]  ;;  %v277_v35 = vld [vmem:[#allocation7 + $0x3f8] sm:$0xff]  ;;  %v215_v36 = vld [vmem:[#allocation7 + $0x208] sm:$0xff] }
  0x39   :  { %426 = vmatpush.msrb.mxu1 %v304_v63  ;;  %392 = vmatpush.msra.mxu3 %v182_v3  ;;  %v266_v37 = vld [vmem:[#allocation7 + $0x3a0] sm:$0xff]  ;;  %v204_v38 = vld [vmem:[#allocation7 + $0x1b0] sm:$0xff]  ;;  %v267_v39 = vld [vmem:[#allocation7 + $0x3a8] sm:$0xff] }
  0x3a   :  { %449 = vmatpush.msrb.mxu2 %v305_v0  ;;  %413 = vmatpush.msrb.mxu0 %v203_v1  ;;  %v205_v40 = vld [vmem:[#allocation7 + $0x1b8] sm:$0xff]  ;;  %v256_v41 = vld [vmem:[#allocation7 + $0x350] sm:$0xff]  ;;  %v194_v42 = vld [vmem:[#allocation7 + $0x160] sm:$0xff] }
  0x3b   :  { %427 = vmatpush.msrb.mxu1 %v294_v2  ;;  %393 = vmatpush.msra.mxu3 %v172_v7  ;;  %v257_v43 = vld [vmem:[#allocation7 + $0x358] sm:$0xff]  ;;  %v195_v44 = vld [vmem:[#allocation7 + $0x168] sm:$0xff]  ;;  %v184_v45 = vld [vmem:[#allocation7 + $0x110] sm:$0xff] }
  0x3c   :  { %450 = vmatpush.msrb.mxu2 %v295_v4  ;;  %414 = vmatpush.msrb.mxu0 %v193_v5  ;;  %v185_v46 = vld [vmem:[#allocation7 + $0x118] sm:$0xff]  ;;  %v174_v47 = vld [vmem:[#allocation7 + $0xc0] sm:$0xff]  ;;  %v175_v48 = vld [vmem:[#allocation7 + $0xc8] sm:$0xff] }
  0x3d   :  { %428 = vmatpush.msrb.mxu1 %v284_v6  ;;  %394 = vmatpush.msra.mxu3 %v162_v11  ;;  %v246_v49 = vld [vmem:[#allocation7 + $0x300] sm:$0xff]  ;;  %v247_v50 = vld [vmem:[#allocation7 + $0x308] sm:$0xff]  ;;  %v164_v51 = vld [vmem:[#allocation7 + $0x70] sm:$0xff] }
  0x3e   :  { %451 = vmatpush.msrb.mxu2 %v285_v8  ;;  %415 = vmatpush.msrb.mxu0 %v183_v9  ;;  %v165_v52 = vld [vmem:[#allocation7 + $0x78] sm:$0xff]  ;;  %v236_v53 = vld [vmem:[#allocation7 + $0x2b0] sm:$0xff]  ;;  %v154_v55 = vld [vmem:[#allocation7 + $0x20] sm:$0xff] }
  0x3f   :  { %429 = vmatpush.msrb.mxu1 %v274_v10  ;;  %395 = vmatpush.msra.mxu3 %v152_v15  ;;  %v237_v54 = vld [vmem:[#allocation7 + $0x2b8] sm:$0xff]  ;;  %v155_v56 = vld [vmem:[#allocation7 + $0x28] sm:$0xff]  ;;  %v226_v57 = vld [vmem:[#allocation7 + $0x260] sm:$0xff] }
  0x40   :  { %452 = vmatpush.msrb.mxu2 %v275_v12  ;;  %416 = vmatpush.msrb.mxu0 %v173_v13  ;;  %v227_v58 = vld [vmem:[#allocation7 + $0x268] sm:$0xff]  ;;  %v216_v59 = vld [vmem:[#allocation7 + $0x210] sm:$0xff]  ;;  %v217_v60 = vld [vmem:[#allocation7 + $0x218] sm:$0xff] }
  0x41   :  { %430 = vmatpush.msrb.mxu1 %v264_v14  ;;  %472 = vmatpush.msrb.mxu3 %v306_v19  ;;  %v206_v61 = vld [vmem:[#allocation7 + $0x1c0] sm:$0xff]  ;;  %v207_v62 = vld [vmem:[#allocation7 + $0x1c8] sm:$0xff]  ;;  %v196_v63 = vld [vmem:[#allocation7 + $0x170] sm:$0xff] }
  0x42   :  { %453 = vmatpush.msrb.mxu2 %v265_v16  ;;  %417 = vmatpush.msrb.mxu0 %v163_v17  ;;  %v197_v0 = vld [vmem:[#allocation7 + $0x178] sm:$0xff]  ;;  %v186_v1 = vld [vmem:[#allocation7 + $0x120] sm:$0xff]  ;;  %v187_v2 = vld [vmem:[#allocation7 + $0x128] sm:$0xff] }
  0x43   :  { %431 = vmatpush.msrb.mxu1 %v254_v18  ;;  %473 = vmatpush.msrb.mxu3 %v296_v25  ;;  %v176_v3 = vld [vmem:[#allocation7 + $0xd0] sm:$0xff]  ;;  %v177_v4 = vld [vmem:[#allocation7 + $0xd8] sm:$0xff]  ;;  %v166_v5 = vld [vmem:[#allocation7 + $0x80] sm:$0xff] }
  0x44   :  { %454 = vmatpush.msrb.mxu2 %v255_v20  ;;  %418 = vmatpush.msrb.mxu0 %v153_v21  ;;  %v167_v6 = vld [vmem:[#allocation7 + $0x88] sm:$0xff]  ;;  %v156_v7 = vld [vmem:[#allocation7 + $0x30] sm:$0xff]  ;;  %v157_v8 = vld [vmem:[#allocation7 + $0x38] sm:$0xff] }
  0x45   :  { %432 = vmatpush.msrb.mxu1 %v244_v22  ;;  %474 = vmatpush.msrb.mxu3 %v286_v29  ;;  %v809_v9 = vld [vmem:[%s1090_s2] ss:$0 sm:$0xff]  ;;  %v308_v12 = vld [vmem:[#allocation7 + $0x4f0] sm:$0xff]  ;;  %v298_v14 = vld [vmem:[#allocation7 + $0x4a0] sm:$0xff] }
  0x46   :  { %495 = vmatpush.msra.mxu0 %v307_v23  ;;  %455 = vmatpush.msrb.mxu2 %v245_v24  ;;  %v309_v13 = vld [vmem:[#allocation7 + $0x4f8] sm:$0xff]  ;;  %v299_v15 = vld [vmem:[#allocation7 + $0x4a8] sm:$0xff]  ;;  %v288_v16 = vld [vmem:[#allocation7 + $0x450] sm:$0xff] }
  0x47   :  { %433 = vmatpush.msrb.mxu1 %v234_v26  ;;  %475 = vmatpush.msrb.mxu3 %v276_v33  ;;  %v289_v17 = vld [vmem:[#allocation7 + $0x458] sm:$0xff]  ;;  %v278_v19 = vld [vmem:[#allocation7 + $0x400] sm:$0xff]  ;;  %v279_v20 = vld [vmem:[#allocation7 + $0x408] sm:$0xff] }
  0x48   :  { %496 = vmatpush.msra.mxu0 %v297_v27  ;;  %456 = vmatpush.msrb.mxu2 %v235_v28  ;;  %v268_v22 = vld [vmem:[#allocation7 + $0x3b0] sm:$0xff]  ;;  %v269_v23 = vld [vmem:[#allocation7 + $0x3b8] sm:$0xff]  ;;  %v258_v24 = vld [vmem:[#allocation7 + $0x360] sm:$0xff] }
  0x49   :  { %434 = vmatpush.msrb.mxu1 %v224_v30  ;;  %476 = vmatpush.msrb.mxu3 %v266_v37  ;;  %v259_v25 = vld [vmem:[#allocation7 + $0x368] sm:$0xff]  ;;  %v248_v26 = vld [vmem:[#allocation7 + $0x310] sm:$0xff]  ;;  %v249_v27 = vld [vmem:[#allocation7 + $0x318] sm:$0xff] }
  0x4a   :  { %497 = vmatpush.msra.mxu0 %v287_v31  ;;  %457 = vmatpush.msrb.mxu2 %v225_v32  ;;  %v589_v28 = vld [vmem:[#allocation10 + $0x78] sm:$0xff]  ;;  %v588_v29 = vld [vmem:[#allocation10 + $0x70] sm:$0xff]  ;;  %v228_v33 = vld [vmem:[#allocation7 + $0x270] sm:$0xff] }
  0x4b   :  { %435 = vmatpush.msrb.mxu1 %v214_v34  ;;  %477 = vmatpush.msrb.mxu3 %v256_v41  ;;  %v238_v30 = vld [vmem:[#allocation7 + $0x2c0] sm:$0xff]  ;;  %v239_v31 = vld [vmem:[#allocation7 + $0x2c8] sm:$0xff]  ;;  %v229_v34 = vld [vmem:[#allocation7 + $0x278] sm:$0xff] }
  0x4c   :  { %498 = vmatpush.msra.mxu0 %v277_v35  ;;  %458 = vmatpush.msrb.mxu2 %v215_v36  ;;  %v605_v32 = vld [vmem:[#allocation10 + $0xf8] sm:$0xff]  ;;  %v587_v35 = vld [vmem:[#allocation10 + $0x68] sm:$0xff]  ;;  %v604_v36 = vld [vmem:[#allocation10 + $0xf0] sm:$0xff] }
  0x4d   :  { %436 = vmatpush.msrb.mxu1 %v204_v38  ;;  %478 = vmatpush.msrb.mxu3 %v246_v49  ;;  %v218_v37 = vld [vmem:[#allocation7 + $0x220] sm:$0xff]  ;;  %v219_v38 = vld [vmem:[#allocation7 + $0x228] sm:$0xff]  ;;  %v209_v41 = vld [vmem:[#allocation7 + $0x1d8] sm:$0xff] }
  0x4e   :  { %499 = vmatpush.msra.mxu0 %v267_v39  ;;  %459 = vmatpush.msrb.mxu2 %v205_v40  ;;  %v586_v39 = vld [vmem:[#allocation10 + $0x60] sm:$0xff] }
  0x4f   :  { %437 = vmatpush.msrb.mxu1 %v194_v42  ;;  %479 = vmatpush.msrb.mxu3 %v236_v53  ;;  %v208_v40 = vld [vmem:[#allocation7 + $0x1d0] sm:$0xff]  ;;  %v585_v42 = vld [vmem:[#allocation10 + $0x58] sm:$0xff] }
  0x50   :  { %500 = vmatpush.msra.mxu0 %v257_v43  ;;  %460 = vmatpush.msrb.mxu2 %v195_v44  ;;  %v198_v43 = vld [vmem:[#allocation7 + $0x180] sm:$0xff]  ;;  %v199_v44 = vld [vmem:[#allocation7 + $0x188] sm:$0xff] }
  0x51   :  { %438 = vmatpush.msrb.mxu1 %v184_v45  ;;  %480 = vmatpush.msrb.mxu3 %v226_v57  ;;  %v188_v45 = vld [vmem:[#allocation7 + $0x130] sm:$0xff]  ;;  %v179_v49 = vld [vmem:[#allocation7 + $0xe8] sm:$0xff] }
  0x52   :  { %461 = vmatpush.msrb.mxu2 %v185_v46  ;;  %501 = vmatpush.msra.mxu0 %v247_v50  ;;  %v189_v46 = vld [vmem:[#allocation7 + $0x138] sm:$0xff]  ;;  %v582_v53 = vld [vmem:[#allocation10 + $0x40] sm:$0xff]  ;;  %v581_v57 = vld [vmem:[#allocation10 + $0x38] sm:$0xff] }
  0x53   :  { %439 = vmatpush.msrb.mxu1 %v174_v47  ;;  %481 = vmatpush.msrb.mxu3 %v216_v59  ;;  %v584_v47 = vld [vmem:[#allocation10 + $0x50] sm:$0xff]  ;;  %v583_v50 = vld [vmem:[#allocation10 + $0x48] sm:$0xff] }
  0x54   :  { %462 = vmatpush.msrb.mxu2 %v175_v48  ;;  %502 = vmatpush.msra.mxu0 %v237_v54  ;;  %v178_v48 = vld [vmem:[#allocation7 + $0xe0] sm:$0xff] }
  0x55   :  { %440 = vmatpush.msrb.mxu1 %v164_v51  ;;  %482 = vmatpush.msrb.mxu3 %v206_v61  ;;  %v168_v51 = vld [vmem:[#allocation7 + $0x90] sm:$0xff]  ;;  %v158_v54 = vld [vmem:[#allocation7 + $0x40] sm:$0xff] }
  0x56   :  { %463 = vmatpush.msrb.mxu2 %v165_v52  ;;  %503 = vmatpush.msra.mxu0 %v227_v58  ;;  %v169_v52 = vld [vmem:[#allocation7 + $0x98] sm:$0xff]  ;;  %v618_v61 = vld [vmem:[#allocation10 + $0x160] sm:$0xff] }
  0x57   :  { %441 = vmatpush.msrb.mxu1 %v154_v55  ;;  %483 = vmatpush.msrb.mxu3 %v196_v63  ;;  %v159_v55 = vld [vmem:[#allocation7 + $0x48] sm:$0xff]  ;;  %v620_v58 = vld [vmem:[#allocation10 + $0x170] sm:$0xff]  ;;  %v603_v63 = vld [vmem:[#allocation10 + $0xe8] sm:$0xff] }
  0x58   :  { %464 = vmatpush.msrb.mxu2 %v155_v56  ;;  %504 = vmatpush.msra.mxu0 %v217_v60  ;;  %v621_v56 = vld [vmem:[#allocation10 + $0x178] sm:$0xff]  ;;  %v580_v59 = vld [vmem:[#allocation10 + $0x30] sm:$0xff]  ;;  %v619_v60 = vld [vmem:[#allocation10 + $0x168] sm:$0xff] }
  0x59   :  { %484 = vmatpush.msrb.mxu3 %v186_v1  ;;  %v579_v1 = vld [vmem:[#allocation10 + $0x28] sm:$0xff] }
  0x5a   :  { %505 = vmatpush.msra.mxu0 %v207_v62  ;;  %v617_v62 = vld [vmem:[#allocation10 + $0x158] sm:$0xff] }
  0x5b   :  { %485 = vmatpush.msrb.mxu3 %v176_v3  ;;  %v615_v3 = vld [vmem:[#allocation10 + $0x148] sm:$0xff] }
  0x5c   :  { %506 = vmatpush.msra.mxu0 %v197_v0  ;;  %v616_v0 = vld [vmem:[#allocation10 + $0x150] sm:$0xff] }
  0x5d   :  { %486 = vmatpush.msrb.mxu3 %v166_v5  ;;  %v601_v5 = vld [vmem:[#allocation10 + $0xd8] sm:$0xff] }
  0x5e   :  { %507 = vmatpush.msra.mxu0 %v187_v2  ;;  %v602_v2 = vld [vmem:[#allocation10 + $0xe0] sm:$0xff] }
  0x5f   :  { %487 = vmatpush.msrb.mxu3 %v156_v7  ;;  %v577_v7 = vld [vmem:[#allocation10 + $0x18] sm:$0xff] }
  0x60   :  { %508 = vmatpush.msra.mxu0 %v177_v4  ;;  %v578_v4 = vld [vmem:[#allocation10 + $0x20] sm:$0xff] }
  0x62   :  { %509 = vmatpush.msra.mxu0 %v167_v6  ;;  %v614_v6 = vld [vmem:[#allocation10 + $0x140] sm:$0xff] }
  0x64   :  { %510 = vmatpush.msra.mxu0 %v157_v8  ;;  %v600_v8 = vld [vmem:[#allocation10 + $0xd0] sm:$0xff] }
  0xa2   :  { %v144_v10 = vpop.f32.mrf.mxu0 }
  0xa3   :  { %v1042_v11 = vadd.f32 %v809_v9, %v144_v10  ;;  %v637_v10 = vld [vmem:[#allocation10 + $0x1f8] sm:$0xff] }
  0xa5   :  { %350 = vmatmul.f32.vlgmr.msra.gmra.mxu1 %v1042_v11  ;;  %373 = vmatmul.f32.vlgmr.msra.gmra.mxu2 %v1042_v11 }
  0xa6   :  { %396 = vmatmul.f32.vlgmr.msra.gmra.mxu3 %v1042_v11  ;;  %419 = vmatmul.f32.vlgmr.msrb.gmra.mxu0 %v1042_v11 }
  0xa7   :  { %518 = vmatpush.msra.mxu1 %v308_v12  ;;  %541 = vmatpush.msra.mxu2 %v309_v13  ;;  %v599_v12 = vld [vmem:[#allocation10 + $0xc8] sm:$0xff]  ;;  %v612_v13 = vld [vmem:[#allocation10 + $0x130] sm:$0xff] }
  0xa8   :  { %658 = vmatpush.msra.mxu3 %v589_v28  ;;  %681 = vmatpush.msrb.mxu0 %v605_v32  ;;  %v595_v28 = vld [vmem:[#allocation10 + $0xa8] sm:$0xff]  ;;  %v594_v32 = vld [vmem:[#allocation10 + $0xa0] sm:$0xff] }
  0xa9   :  { %519 = vmatpush.msra.mxu1 %v298_v14  ;;  %542 = vmatpush.msra.mxu2 %v299_v15  ;;  %v636_v14 = vld [vmem:[#allocation10 + $0x1f0] sm:$0xff]  ;;  %v575_v15 = vld [vmem:[#allocation10 + $0x8] sm:$0xff] }
  0xaa   :  { %v147_v18 = vpop.f32.mrf.mxu0  ;;  %659 = vmatpush.msra.mxu3 %v588_v29  ;;  %682 = vmatpush.msrb.mxu0 %v604_v36  ;;  %v608_v29 = vld [vmem:[#allocation10 + $0x110] sm:$0xff]  ;;  %v593_v36 = vld [vmem:[#allocation10 + $0x98] sm:$0xff] }
  0xab   :  { %v1048_v21 = vadd.f32 %v809_v9, %v147_v18  ;;  %520 = vmatpush.msra.mxu1 %v288_v16  ;;  %543 = vmatpush.msra.mxu2 %v289_v17  ;;  %v613_v9 = vld [vmem:[#allocation10 + $0x138] sm:$0xff]  ;;  %v598_v16 = vld [vmem:[#allocation10 + $0xc0] sm:$0xff]  ;;  %v611_v17 = vld [vmem:[#allocation10 + $0x128] sm:$0xff] }
  0xac   :  { %660 = vmatpush.msra.mxu3 %v587_v35  ;;  %683 = vmatpush.msrb.mxu0 %v603_v63  ;;  %v635_v18 = vld [vmem:[#allocation10 + $0x1e8] sm:$0xff]  ;;  %v650_v35 = vld [vmem:[#allocation10 + $0x260] sm:$0xff] }
  0xad   :  { %521 = vmatpush.msra.mxu1 %v278_v19  ;;  %544 = vmatpush.msra.mxu2 %v279_v20  ;;  %v574_v19 = vld [vmem:[#allocation10] sm:$0xff]  ;;  %v597_v20 = vld [vmem:[#allocation10 + $0xb8] sm:$0xff] }
  0xae   :  { %353 = vmatmul.f32.gmra.mxu1 %v1048_v21  ;;  %376 = vmatmul.f32.gmra.mxu2 %v1048_v21 }
  0xaf   :  { %399 = vmatmul.f32.gmra.mxu3 %v1048_v21  ;;  %422 = vmatmul.f32.gmra.mxu0 %v1048_v21 }
  0xb0   :  { %522 = vmatpush.msra.mxu1 %v268_v22  ;;  %545 = vmatpush.msra.mxu2 %v269_v23  ;;  %v634_v22 = vld [vmem:[#allocation10 + $0x1e0] sm:$0xff]  ;;  %v653_v23 = vld [vmem:[#allocation10 + $0x278] sm:$0xff] }
  0xb1   :  { %661 = vmatpush.msra.mxu3 %v586_v39  ;;  %684 = vmatpush.msrb.mxu0 %v602_v2  ;;  %v649_v39 = vld [vmem:[#allocation10 + $0x258] sm:$0xff]  ;;  %v639_v2 = vld [vmem:[#allocation10 + $0x208] sm:$0xff] }
  0xb2   :  { %523 = vmatpush.msra.mxu1 %v258_v24  ;;  %546 = vmatpush.msra.mxu2 %v259_v25  ;;  %v596_v24 = vld [vmem:[#allocation10 + $0xb0] sm:$0xff]  ;;  %v609_v25 = vld [vmem:[#allocation10 + $0x118] sm:$0xff] }
  0xb3   :  { %662 = vmatpush.msra.mxu3 %v585_v42  ;;  %685 = vmatpush.msrb.mxu0 %v601_v5  ;;  %v648_v42 = vld [vmem:[#allocation10 + $0x250] sm:$0xff] }
  0xb4   :  { %524 = vmatpush.msra.mxu1 %v248_v26  ;;  %547 = vmatpush.msra.mxu2 %v249_v27  ;;  %v633_v26 = vld [vmem:[#allocation10 + $0x1d8] sm:$0xff]  ;;  %v652_v27 = vld [vmem:[#allocation10 + $0x270] sm:$0xff] }
  0xb5   :  { %663 = vmatpush.msra.mxu3 %v584_v47  ;;  %686 = vmatpush.msrb.mxu0 %v600_v8  ;;  %v627_v47 = vld [vmem:[#allocation10 + $0x1a8] sm:$0xff] }
  0xb6   :  { %525 = vmatpush.msra.mxu1 %v238_v30  ;;  %548 = vmatpush.msra.mxu2 %v239_v31  ;;  %v632_v30 = vld [vmem:[#allocation10 + $0x1d0] sm:$0xff]  ;;  %v651_v31 = vld [vmem:[#allocation10 + $0x268] sm:$0xff] }
  0xb7   :  { %442 = vmatmul.f32.vlgmr.msrb.gmra.mxu1 %v1042_v11  ;;  %465 = vmatmul.f32.vlgmr.msrb.gmra.mxu2 %v1042_v11 }
  0xb8   :  { %488 = vmatmul.f32.vlgmr.msrb.gmra.mxu3 %v1042_v11  ;;  %511 = vmatmul.f32.vlgmr.msra.gmra.mxu0 %v1042_v11 }
  0xb9   :  { %526 = vmatpush.msra.mxu1 %v228_v33  ;;  %549 = vmatpush.msra.mxu2 %v229_v34  ;;  %v607_v33 = vld [vmem:[#allocation10 + $0x108] sm:$0xff] }
  0xba   :  { %664 = vmatpush.msra.mxu3 %v583_v50  ;;  %687 = vmatpush.msrb.mxu0 %v599_v12  ;;  %v631_v34 = vld [vmem:[#allocation10 + $0x1c8] sm:$0xff]  ;;  %v645_v50 = vld [vmem:[#allocation10 + $0x238] sm:$0xff] }
  0xbb   :  { %527 = vmatpush.msra.mxu1 %v218_v37  ;;  %550 = vmatpush.msra.mxu2 %v219_v38  ;;  %v606_v37 = vld [vmem:[#allocation10 + $0x100] sm:$0xff] }
  0xbc   :  { %665 = vmatpush.msra.mxu3 %v582_v53  ;;  %688 = vmatpush.msrb.mxu0 %v598_v16  ;;  %v630_v38 = vld [vmem:[#allocation10 + $0x1c0] sm:$0xff]  ;;  %v625_v53 = vld [vmem:[#allocation10 + $0x198] sm:$0xff] }
  0xbd   :  { %528 = vmatpush.msra.mxu1 %v208_v40  ;;  %551 = vmatpush.msra.mxu2 %v209_v41  ;;  %v592_v40 = vld [vmem:[#allocation10 + $0x90] sm:$0xff]  ;;  %v629_v41 = vld [vmem:[#allocation10 + $0x1b8] sm:$0xff] }
  0xbe   :  { %666 = vmatpush.msra.mxu3 %v581_v57  ;;  %689 = vmatpush.msrb.mxu0 %v597_v20  ;;  %v623_v57 = vld [vmem:[#allocation10 + $0x188] sm:$0xff] }
  0xbf   :  { %529 = vmatpush.msra.mxu1 %v198_v43  ;;  %552 = vmatpush.msra.mxu2 %v199_v44  ;;  %v591_v43 = vld [vmem:[#allocation10 + $0x88] sm:$0xff]  ;;  %v628_v44 = vld [vmem:[#allocation10 + $0x1b0] sm:$0xff] }
  0xc0   :  { %445 = vmatmul.f32.gmra.mxu1 %v1048_v21  ;;  %468 = vmatmul.f32.gmra.mxu2 %v1048_v21 }
  0xc1   :  { %491 = vmatmul.f32.gmra.mxu3 %v1048_v21  ;;  %514 = vmatmul.f32.gmra.mxu0 %v1048_v21 }
  0xc2   :  { %530 = vmatpush.msra.mxu1 %v188_v45  ;;  %553 = vmatpush.msra.mxu2 %v189_v46  ;;  %v647_v45 = vld [vmem:[#allocation10 + $0x248] sm:$0xff]  ;;  %v590_v46 = vld [vmem:[#allocation10 + $0x80] sm:$0xff] }
  0xc3   :  { %667 = vmatpush.msra.mxu3 %v580_v59  ;;  %690 = vmatpush.msrb.mxu0 %v596_v24 }
  0xc4   :  { %531 = vmatpush.msra.mxu1 %v178_v48  ;;  %554 = vmatpush.msra.mxu2 %v179_v49  ;;  %v646_v48 = vld [vmem:[#allocation10 + $0x240] sm:$0xff] }
  0xc5   :  { %668 = vmatpush.msra.mxu3 %v579_v1  ;;  %691 = vmatpush.msrb.mxu0 %v595_v28  ;;  %v626_v49 = vld [vmem:[#allocation10 + $0x1a0] sm:$0xff] }
  0xc6   :  { %532 = vmatpush.msra.mxu1 %v168_v51  ;;  %555 = vmatpush.msra.mxu2 %v169_v52 }
  0xc7   :  { %669 = vmatpush.msra.mxu3 %v578_v4  ;;  %692 = vmatpush.msrb.mxu0 %v594_v32  ;;  %v1068_v4 = vld [vmem:[#allocation8] sm:$0xff] }
  0xc8   :  { %533 = vmatpush.msra.mxu1 %v158_v54  ;;  %556 = vmatpush.msra.mxu2 %v159_v55  ;;  %v644_v54 = vld [vmem:[#allocation10 + $0x230] sm:$0xff]  ;;  %v321_v8 = vperm.slane %v1068_v4, 7  ;;  %v317_v32 = vperm.slane %v1068_v4, 3 }
  0xc9   :  { %534 = vmatmul.f32.vlgmr.msra.gmra.mxu1 %v1042_v11  ;;  %557 = vmatmul.f32.vlgmr.msra.gmra.mxu2 %v1042_v11  ;;  %v576_v11 = vld [vmem:[#allocation10 + $0x10] sm:$0xff] }
  0xca   :  { %704 = vmatpush.msrb.mxu1 %v621_v56  ;;  %670 = vmatpush.msra.mxu3 %v577_v7  ;;  %v624_v55 = vld [vmem:[#allocation10 + $0x190] sm:$0xff]  ;;  %v643_v56 = vld [vmem:[#allocation10 + $0x228] sm:$0xff] }
  0xcb   :  { %727 = vmatpush.msrb.mxu2 %v637_v10  ;;  %693 = vmatpush.msrb.mxu0 %v593_v36 }
  0xcc   :  { %705 = vmatpush.msrb.mxu1 %v620_v58  ;;  %671 = vmatpush.msra.mxu3 %v576_v11  ;;  %v642_v58 = vld [vmem:[#allocation10 + $0x220] sm:$0xff] }
  0xcd   :  { %728 = vmatpush.msrb.mxu2 %v636_v14  ;;  %694 = vmatpush.msrb.mxu0 %v592_v40  ;;  %v319_v14 = vperm.slane %v1068_v4, 5 }
  0xce   :  { %706 = vmatpush.msrb.mxu1 %v619_v60  ;;  %672 = vmatpush.msra.mxu3 %v575_v15  ;;  %v315_v15 = vperm.slane %v1068_v4, 1 }
  0xcf   :  { %729 = vmatpush.msrb.mxu2 %v635_v18  ;;  %695 = vmatpush.msrb.mxu0 %v591_v43 }
  0xd0   :  { %707 = vmatpush.msrb.mxu1 %v618_v61  ;;  %673 = vmatpush.msra.mxu3 %v574_v19  ;;  %v622_v61 = vld [vmem:[#allocation10 + $0x180] sm:$0xff] }
  0xd1   :  { %537 = vmatmul.f32.gmra.mxu1 %v1048_v21  ;;  %560 = vmatmul.f32.gmra.mxu2 %v1048_v21  ;;  %v610_v21 = vld [vmem:[#allocation10 + $0x120] sm:$0xff] }
  0xd2   :  { %708 = vmatpush.msrb.mxu1 %v617_v62  ;;  %730 = vmatpush.msrb.mxu2 %v634_v22  ;;  %v641_v62 = vld [vmem:[#allocation10 + $0x218] sm:$0xff] }
  0xd3   :  { %750 = vmatpush.msrb.mxu3 %v653_v23  ;;  %696 = vmatpush.msrb.mxu0 %v590_v46 }
  0xd4   :  { %709 = vmatpush.msrb.mxu1 %v616_v0  ;;  %731 = vmatpush.msrb.mxu2 %v633_v26  ;;  %v640_v0 = vld [vmem:[#allocation10 + $0x210] sm:$0xff] }
  0xd5   :  { %751 = vmatpush.msrb.mxu3 %v652_v27 }
  0xd6   :  { %710 = vmatpush.msrb.mxu1 %v615_v3  ;;  %732 = vmatpush.msrb.mxu2 %v632_v30  ;;  %v638_v3 = vld [vmem:[#allocation10 + $0x200] sm:$0xff]  ;;  %v311_v30 = vld [vmem:[#allocation8 + $0x8] sm:$0x3] }
  0xd7   :  { %752 = vmatpush.msrb.mxu3 %v651_v31 }
  0xd8   :  { %711 = vmatpush.msrb.mxu1 %v614_v6  ;;  %733 = vmatpush.msrb.mxu2 %v631_v34  ;;  %v316_v6 = vperm.slane %v1068_v4, 2  ;;  %v322_v34 = vperm.slane %v311_v30, 0 }
  0xd9   :  { %753 = vmatpush.msrb.mxu3 %v650_v35 }
  0xda   :  { %712 = vmatpush.msrb.mxu1 %v613_v9  ;;  %734 = vmatpush.msrb.mxu2 %v630_v38 }
  0xdb   :  { %754 = vmatpush.msrb.mxu3 %v649_v39 }
  0xdc   :  { %713 = vmatpush.msrb.mxu1 %v612_v13  ;;  %735 = vmatpush.msrb.mxu2 %v629_v41  ;;  %v314_v13 = vperm.slane %v1068_v4, 0 }
  0xdd   :  { %755 = vmatpush.msrb.mxu3 %v648_v42 }
  0xde   :  { %714 = vmatpush.msrb.mxu1 %v611_v17  ;;  %736 = vmatpush.msrb.mxu2 %v628_v44  ;;  %v320_v17 = vperm.slane %v1068_v4, 6 }
  0xdf   :  { %756 = vmatpush.msrb.mxu3 %v647_v45  ;;  %v318_v45 = vperm.slane %v1068_v4, 4 }
  0xe0   :  { %715 = vmatpush.msrb.mxu1 %v610_v21  ;;  %737 = vmatpush.msrb.mxu2 %v627_v47  ;;  %v323_v47 = vperm.slane %v311_v30, 1 }
  0xe1   :  { %757 = vmatpush.msrb.mxu3 %v646_v48 }
  0xe2   :  { %716 = vmatpush.msrb.mxu1 %v609_v25  ;;  %738 = vmatpush.msrb.mxu2 %v626_v49 }
  0xe3   :  { %758 = vmatpush.msrb.mxu3 %v645_v50 }
  0xe4   :  { %717 = vmatpush.msrb.mxu1 %v608_v29  ;;  %739 = vmatpush.msrb.mxu2 %v625_v53 }
  0xe5   :  { %759 = vmatpush.msrb.mxu3 %v644_v54 }
  0xe6   :  { %718 = vmatpush.msrb.mxu1 %v607_v33  ;;  %740 = vmatpush.msrb.mxu2 %v624_v55 }
  0xe7   :  { %760 = vmatpush.msrb.mxu3 %v643_v56 }
  0xe8   :  { %719 = vmatpush.msrb.mxu1 %v606_v37  ;;  %741 = vmatpush.msrb.mxu2 %v623_v57 }
  0xe9   :  { %761 = vmatpush.msrb.mxu3 %v642_v58 }
  0xea   :  { %742 = vmatpush.msrb.mxu2 %v622_v61  ;;  %v810_v61 = vld [vmem:[%s1094_s6] ss:$0 sm:$0xff] }
  0xeb   :  { %762 = vmatpush.msrb.mxu3 %v641_v62 }
  0xed   :  { %763 = vmatpush.msrb.mxu3 %v640_v0 }
  0xef   :  { %764 = vmatpush.msrb.mxu3 %v639_v2 }
  0xf1   :  { %765 = vmatpush.msrb.mxu3 %v638_v3 }
 0x122   :  { %v351_v51 = vpop.f32.mrf.mxu1 }
 0x123   :  { %v1066_v52 = vpop.f32.mrf.mxu0  ;;  %v352_v19 = vadd.f32 %v351_v51, %v314_v13 }
 0x124   :  { %v421_v42 = vadd.f32 %v1066_v52, %v317_v32 }
 0x128   :  { %v374_v59 = vpop.f32.mrf.mxu2 }
 0x129   :  { %v397_v60 = vpop.f32.mrf.mxu3  ;;  %v375_v22 = vadd.f32 %v374_v59, %v315_v15 }
 0x12a   :  { %v398_v11 = vadd.f32 %v397_v60, %v316_v6 }
 0x12b   :  { %v354_v63 = vpop.f32.mrf.mxu1 }
 0x12c   :  { %v423_v1 = vpop.f32.mrf.mxu0  ;;  %v355_v35 = vadd.f32 %v354_v63, %v314_v13 }
 0x12d   :  { %v424_v53 = vadd.f32 %v423_v1, %v317_v32 }
 0x131   :  { %v377_v5 = vpop.f32.mrf.mxu2 }
 0x132   :  { %v400_v7 = vpop.f32.mrf.mxu3  ;;  %v378_v38 = vadd.f32 %v377_v5, %v315_v15 }
 0x133   :  { %v401_v28 = vadd.f32 %v400_v7, %v316_v6 }
 0x134   :  { %v443_v9 = vpop.f32.mrf.mxu1 }
 0x135   :  { %v512_v10 = vpop.f32.mrf.mxu0  ;;  %v444_v49 = vadd.f32 %v443_v9, %v318_v45 }
 0x136   :  { %v513_v12 = vadd.f32 %v512_v10, %v321_v8 }
 0x138   :  { %v566_v16 = vmax.f32 %v398_v11, %v513_v12 }
 0x13a   :  { %720 = vmatmul.f32.vlgmr.msrb.gmra.mxu1 %v566_v16  ;;  %v466_v18 = vpop.f32.mrf.mxu2 }
 0x13b   :  { %v467_v20 = vadd.f32 %v466_v18, %v319_v14  ;;  %v489_v21 = vpop.f32.mrf.mxu3 }
 0x13c   :  { %v490_v23 = vadd.f32 %v489_v21, %v320_v17 }
 0x13d   :  { %v564_v24 = vmax.f32 %v352_v19, %v467_v20  ;;  %v446_v25 = vpop.f32.mrf.mxu1 }
 0x13e   :  { %v565_v26 = vmax.f32 %v375_v22, %v490_v23  ;;  %v515_v27 = vpop.f32.mrf.mxu0  ;;  %v447_v57 = vadd.f32 %v446_v25, %v318_v45 }
 0x13f   :  { %v516_v29 = vadd.f32 %v515_v27, %v321_v8  ;;  %674 = vmatmul.f32.vlgmr.msra.gmra.mxu3 %v564_v24 }
 0x140   :  { %697 = vmatmul.f32.vlgmr.msrb.gmra.mxu0 %v565_v26 }
 0x141   :  { %v571_v31 = vmax.f32 %v401_v28, %v516_v29 }
 0x143   :  { %723 = vmatmul.f32.gmra.mxu1 %v571_v31  ;;  %v469_v33 = vpop.f32.mrf.mxu2 }
 0x144   :  { %v470_v36 = vadd.f32 %v469_v33, %v319_v14  ;;  %v492_v37 = vpop.f32.mrf.mxu3 }
 0x145   :  { %v493_v39 = vadd.f32 %v492_v37, %v320_v17 }
 0x146   :  { %v535_v40 = vpop.f32.mrf.mxu1  ;;  %v569_v41 = vmax.f32 %v355_v35, %v470_v36 }
 0x147   :  { %v536_v43 = vadd.f32 %v535_v40, %v322_v34  ;;  %v570_v44 = vmax.f32 %v378_v38, %v493_v39 }
 0x148   :  { %677 = vmatmul.f32.gmra.mxu3 %v569_v41 }
 0x149   :  { %v567_v46 = vmax.f32 %v421_v42, %v536_v43  ;;  %700 = vmatmul.f32.gmra.mxu0 %v570_v44 }
 0x14b   :  { %743 = vmatmul.f32.vlgmr.msrb.gmra.mxu2 %v567_v46 }
 0x14c   :  { %v558_v48 = vpop.f32.mrf.mxu2 }
 0x14d   :  { %v559_v50 = vadd.f32 %v558_v48, %v323_v47 }
 0x14e   :  { %v538_v51 = vpop.f32.mrf.mxu1 }
 0x14f   :  { %v568_v54 = vmax.f32 %v444_v49, %v559_v50  ;;  %v539_v55 = vadd.f32 %v538_v51, %v322_v34 }
 0x151   :  { %766 = vmatmul.f32.vlgmr.msrb.gmra.mxu3 %v568_v54  ;;  %v572_v56 = vmax.f32 %v424_v53, %v539_v55 }
 0x153   :  { %746 = vmatmul.f32.gmra.mxu2 %v572_v56 }
 0x154   :  { %v561_v52 = vpop.f32.mrf.mxu2 }
 0x155   :  { %v562_v58 = vadd.f32 %v561_v52, %v323_v47 }
 0x157   :  { %v573_v59 = vmax.f32 %v447_v57, %v562_v58 }
 0x159   :  { %769 = vmatmul.f32.gmra.mxu3 %v573_v59 }
 0x1b7   :  { %v721_v1 = vpop.f32.mrf.mxu1 }
 0x1bd   :  { %v698_v63 = vpop.f32.mrf.mxu0 }
 0x1c0   :  { %v724_v11 = vpop.f32.mrf.mxu1 }
 0x1c2   :  { %v675_v60 = vpop.f32.mrf.mxu3 }
 0x1c3   :  { %v676_v62 = vadd.f32 %v810_v61, %v675_v60 }
 0x1c5   :  { %v699_v2 = vadd.f32 %v698_v63, %v676_v62 }
 0x1c6   :  { %v701_v7 = vpop.f32.mrf.mxu0 }
 0x1c7   :  { %v722_v5 = vadd.f32 %v721_v1, %v699_v2 }
 0x1cb   :  { %v678_v0 = vpop.f32.mrf.mxu3 }
 0x1cc   :  { %v679_v4 = vadd.f32 %v810_v61, %v678_v0 }
 0x1ce   :  { %v744_v3 = vpop.f32.mrf.mxu2  ;;  %v702_v9 = vadd.f32 %v701_v7, %v679_v4 }
 0x1cf   :  { %v745_v6 = vadd.f32 %v744_v3, %v722_v5 }
 0x1d0   :  { %v725_v13 = vadd.f32 %v724_v11, %v702_v9 }
 0x1d4   :  { %v767_v8 = vpop.f32.mrf.mxu3 }
 0x1d5   :  { %v768_v10 = vadd.f32 %v767_v8, %v745_v6 }
 0x1d6   :  { %v747_v12 = vpop.f32.mrf.mxu2 }
 0x1d7   :  { %773 = vst [vmem:[#allocation11] sm:$0xff] %v768_v10  ;;  %v748_v14 = vadd.f32 %v747_v12, %v725_v13 }
 0x1dc   :  { %v770_v15 = vpop.f32.mrf.mxu3 }
 0x1dd   :  { %v771_v16 = vadd.f32 %v770_v15, %v748_v14 }
 0x1df   :  { %774 = vst [vmem:[#allocation11 + $0x8] sm:$0xff] %v771_v16 }
 0x1e0   :  { %787 = dma.vmem_to_hbm [thread:$0]  %s780_s29, 256, %s782_s8, [#allocation4], %s964_s9, %s964_s9, %s965_s10  }
 0x1e1   :  { %961 = dma.done.wait [#allocation4], 256  }
 0x1e2   :  { %962 = vsyncadd [#allocation4], 4294967040 }
 0x1e3   :  { %792 = vsyncpa [#allocation3], 1 }
 0x1e4   :  { %793 = vsyncpa [#allocation6], 1 }
 0x1e5   :  { %794 = vsyncpa [#allocation9], 1 }
 0x1e6   :  { %795 = vsyncpa [#allocation4], 1 }

</bundles_post_ra>
